<compile_context>
chip_gen: v6e
topology: v6e:2x2x1
jax: 0.10.0
libtpu: 0.0.40
codegen_flags: <defaults>
</compile_context>

<pallas_src>
import numpy as np
import jax
import jax.numpy as jnp
from jax.experimental import pallas as pl
from jax.experimental.pallas import tpu as pltpu


def _haar_ll_kernel(x_ref, m1_ref, o_ref):
    half = o_ref.shape[0]                         # block_rows // 2 (static)
    even = x_ref[pl.ds(0, half, 2), :]            # rows 0, 2, 4, ...  (strided load)
    odd = x_ref[pl.ds(1, half, 2), :]             # rows 1, 3, 5, ...
    rsum = even + odd                             # (half, W) row-pair sums (VPU)
    ll = jnp.dot(rsum, m1_ref[...],               # (half, W//2) column-pair sums (MXU)
                 preferred_element_type=jnp.float32)
    o_ref[...] = (0.5 * ll).astype(o_ref.dtype)   # exact Haar LL scale


def _haar_col_pair_matrix(W, dtype):
    """Exact 0/1 matrix that sums adjacent column pairs: (W, W//2)."""
    m1 = np.zeros((W, W // 2), dtype=np.float32)
    j = np.arange(W // 2)
    m1[2 * j, j] = 1.0
    m1[2 * j + 1, j] = 1.0
    return jnp.asarray(m1, dtype=dtype)


def _choose_block_rows(total_rows, row_bytes, target_bytes=4 << 20):
    """Largest even row count that divides total_rows, fits ~target_bytes of
    input per block, prefers multiples of 16 (clean (8,128) tiling for the
    input and the halved output block), and leaves >= 2 grid steps when the
    problem is big enough (v7x megacore)."""
    cap = max(2, min(total_rows, target_bytes // max(row_bytes, 1)))
    if total_rows >= 4:
        cap = min(cap, total_rows // 2)
    cap = max(2, cap)
    for step in (16, 8, 2):
        r = (cap // step) * step
        while r >= step:
            if total_rows % r == 0:
                return r
            r -= step
    return total_rows


def downsample_dwt_ll(x, *, block_target_bytes=4 << 20):
    """Forward pass of Downsample: x (N, C, H, W) -> LL (N, C, H/2, W/2)."""
    N, C, H, W = x.shape
    if H % 2 or W % 2:
        raise ValueError(f"Haar DWT needs even spatial dims, got H={H}, W={W}")

    total_rows = N * C * H
    xf = x.reshape(total_rows, W)                 # free (contiguous) reshape
    block_rows = _choose_block_rows(total_rows, W * x.dtype.itemsize,
                                    block_target_bytes)
    grid = (total_rows // block_rows,)
    m1 = _haar_col_pair_matrix(W, x.dtype)        # 0/1 entries: exact in bf16/f32

    out = pl.pallas_call(
        _haar_ll_kernel,
        out_shape=jax.ShapeDtypeStruct((total_rows // 2, W // 2), x.dtype),
        grid=grid,
        in_specs=[
            pl.BlockSpec((block_rows, W), lambda i: (i, 0)),   # row slab
            pl.BlockSpec((W, W // 2), lambda i: (0, 0)),       # resident 0/1 matrix
        ],
        out_specs=pl.BlockSpec((block_rows // 2, W // 2), lambda i: (i, 0)),
        compiler_params=pltpu.CompilerParams(
            dimension_semantics=("parallel",)),
    )(xf, m1)

    # (N*C*H/2, W/2) row-major is bit-identical layout to (N, C, H/2, W/2).
    return out.reshape(N, C, H // 2, W // 2)


def _reference_ll(x):
    # Haar LL == 0.5 * sum over each non-overlapping 2x2 block.
    N, C, H, W = x.shape
    xr = x.reshape(N, C, H // 2, 2, W // 2, 2)
    return 0.5 * xr.sum(axis=(3, 5))


if __name__ == "__main__":
    key = jax.random.PRNGKey(0)
    x = jax.random.normal(key, (2, 4, 16, 16), dtype=jnp.float32)

    ll = jax.block_until_ready(downsample_dwt_ll(x))

    ref = _reference_ll(x)
    np.testing.assert_allclose(np.asarray(ll), np.asarray(ref),
                               rtol=1e-5, atol=1e-5)
    assert ll.shape == (2, 4, 8, 8)
    print("KERNEL_OK")
</pallas_src>

<mosaic_0001>
module attributes {stable_mosaic.version = 11 : i64} {
  func.func @_haar_ll_kernel(%arg0: i32, %arg1: memref<64x16xf32, #tpu.memory_space<vmem>>, %arg2: memref<16x8xf32, #tpu.memory_space<vmem>>, %arg3: memref<32x8xf32, #tpu.memory_space<vmem>>) attributes {dimension_semantics = [#tpu.dimension_semantics<parallel>], iteration_bounds = array<i64: 2>, scalar_prefetch = 0 : i64, scratch_operands = 0 : i64, tpu.core_type = #tpu.core_type<tc>, window_params = [{transform_indices = @transform_0, window_bounds = array<i64: 64, 16>}, {pipeline_mode = #tpu.pipeline_mode<synchronous>, transform_indices = @transform_1, window_bounds = array<i64: 16, 8>}, {transform_indices = @transform_2, window_bounds = array<i64: 32, 8>}]} {
    %c0 = arith.constant 0 : index
    %c0_0 = arith.constant 0 : index
    %0 = tpu.strided_load %arg1[%c0, %c0_0] {strides = array<i32: 2, 1>} : memref<64x16xf32, #tpu.memory_space<vmem>>, vector<32x16xf32>
    %c1 = arith.constant 1 : index
    %c0_1 = arith.constant 0 : index
    %1 = tpu.strided_load %arg1[%c1, %c0_1] {strides = array<i32: 2, 1>} : memref<64x16xf32, #tpu.memory_space<vmem>>, vector<32x16xf32>
    %2 = arith.addf %0, %1 : vector<32x16xf32>
    %c0_2 = arith.constant 0 : index
    %c0_3 = arith.constant 0 : index
    %3 = vector.load %arg2[%c0_2, %c0_3] : memref<16x8xf32, #tpu.memory_space<vmem>>, vector<16x8xf32>
    %cst = arith.constant dense<0.000000e+00> : vector<32x8xf32>
    %4 = tpu.matmul %2, %3, %cst {dimension_numbers = #tpu.dot_dimension_numbers<[1], [0], [0], [1], [0, 0, 1, 1], [], []>} : vector<32x16xf32>, vector<16x8xf32>, vector<32x8xf32> -> vector<32x8xf32>
    %cst_4 = arith.constant 5.000000e-01 : f32
    %5 = vector.broadcast %cst_4 : f32 to vector<32x8xf32>
    %6 = arith.mulf %5, %4 : vector<32x8xf32>
    %c0_5 = arith.constant 0 : index
    %c0_6 = arith.constant 0 : index
    %7 = vector.load %arg3[%c0_5, %c0_6] : memref<32x8xf32, #tpu.memory_space<vmem>>, vector<32x8xf32>
    tpu.vector_store %arg3[%c0_5, %c0_6], %6 {strides = array<i32>} : memref<32x8xf32, #tpu.memory_space<vmem>>, vector<32x8xf32>,
    return
  }
  func.func @transform_0(%arg0: i32) -> (i32, i32) {
    %c0_i32 = arith.constant 0 : i32
    %c0_i32_0 = arith.constant 0 : i32
    return %arg0, %c0_i32 : i32, i32
  }
  func.func @transform_1(%arg0: i32) -> (i32, i32) {
    %c0_i32 = arith.constant 0 : i32
    %c0_i32_0 = arith.constant 0 : i32
    %c0_i32_1 = arith.constant 0 : i32
    return %c0_i32, %c0_i32_0 : i32, i32
  }
  func.func @transform_2(%arg0: i32) -> (i32, i32) {
    %c0_i32 = arith.constant 0 : i32
    %c0_i32_0 = arith.constant 0 : i32
    return %arg0, %c0_i32 : i32, i32
  }
}

</mosaic_0001>

<bundles_post_ra>
// kernel: tpu_custom_call.1
= control target key start
LH: loop header
LB: loop body
LE: loop exit
PB: predicated region body
PF: predicated region fallthrough
CT: control target
= control target key end

     0   :  { %s404_s9 = smov 0   ;;  %s435_s0 = inlined_call_operand.vmem [shape: f32[128,16], index: 0, kind: input, shape index: {}]   ;;  %s436_s1 = inlined_call_operand.vmem [shape: f32[16,8], index: 1, kind: input, shape index: {}]   ;;  %s437_s2 = inlined_call_operand.vmem [shape: f32[64,8], index: 2, kind: output, shape index: {}]  }
   0x1 LB: > { %s331_s10 = sadd.s32 4294967295, %s387_s9   ;;  %p335_p0 = scmp.ge.s32.totalorder %s387_s9, 1  ;;  %s387_s9 = sphi %s404_s9, %s12_s9  }
   0x2   : > { %p113_p1 = scmp.lt.s32.totalorder %s387_s9, 3 }
   0x4   : > { %p114_p2 = pnand %p335_p0, %p113_p1 }
   0x5   : > { %s336_s15 = sshll.u32 (!%p114_p2), %s331_s10, 3  ;;  %s338_s20 = sshll.u32 (!%p114_p2), %s331_s10, 2 }
   0x6   : > { %117 = sbr.rel (%p114_p2) target bundleno = 217 (0xd9), region = 28  ;;  %p136_p3 = scmp.lt.s32.totalorder (!%p114_p2), %s336_s15, 15 }
   0x7   : > { %p142_p4 = scmp.lt.s32.totalorder (!%p114_p2), %s338_s20, 7 }
   0xb   : > { %v167_v0 = vld [vmem:[%s436_s1 + $0x8] sm:$0xff]  ;;  %v166_v1 = vld [vmem:[%s436_s1] sm:$0xff]  ;;  %s439_s15 = smov (!%p136_p3, %s336_s15), 15  ;;  %vm168_vm0 = vcmask 130048   ;;  %s441_s20 = smov (!%p142_p4, %s338_s20), 7  ;;  %vm270_vm1 = vcmask 64512  }
   0xc   : > { %359 = vmatprep.subr.mxu0 %v167_v0  ;;  %369 = vmatprep.subr.mxu1 %v167_v0  ;;  %s337_s16 = sshll.u32 %s439_s15, 3  ;;  %s339_s21 = sshll.u32 %s441_s20, 3 }
   0xd   : > { %360 = vmatpush3.msra.mxu0 %v167_v0  ;;  %371 = vmatpush3.msra.mxu1 %v167_v0  ;;  %s139_s19 = scalar_lea.vmem %s435_s0, %s337_s16  ;;  %s145_s24 = scalar_lea.vmem %s437_s2, %s339_s21 }
   0xe   : > { %361 = vmatprep.subr.mxu0 %v166_v1  ;;  %370 = vmatprep.subr.mxu1 %v166_v1  ;;  %v147_v2 = vld [vmem:[%s139_s19] ss:$2 sm:$0xff]  ;;  %v343_v3 = vld [vmem:[%s139_s19 + $0x1] ss:$2 sm:$0xff]  ;;  %v340_v7 = vld [vmem:[%s139_s19 + $0x10] ss:$2 sm:$0xff] }
   0xf   : > { %362 = vmatpush3.msra.mxu0 %v166_v1  ;;  %372 = vmatpush3.msra.mxu1 %v166_v1  ;;  %v341_v4 = vld [vmem:[%s139_s19 + $0x20] ss:$2 sm:$0xff]  ;;  %v162_v5 = vadd.f32 %v343_v3, %v147_v2  ;;  %v345_v6 = vld [vmem:[%s139_s19 + $0x21] ss:$2 sm:$0xff]  ;;  %v344_v8 = vld [vmem:[%s139_s19 + $0x11] ss:$2 sm:$0xff] }
  0x10   : > { %v164_v9 = vadd.f32 %v345_v6, %v341_v4  ;;  %v163_v10 = vadd.f32 %v344_v8, %v340_v7  ;;  %v342_v11 = vld [vmem:[%s139_s19 + $0x30] ss:$2 sm:$0xff]  ;;  %v346_v12 = vld [vmem:[%s139_s19 + $0x31] ss:$2 sm:$0xff] }
  0x11   : > { %363 = vmatprep.mubr.msk.f32.mxu0 %vm168_vm0, %v162_v5  ;;  %v165_v13 = vadd.f32 %v346_v12, %v342_v11 }
  0x12   : > { %366 = vmatprep.mubr.msk.f32.mxu1 %vm168_vm0, %v164_v9  ;;  %364 = vmatmul.mubr.msk.f32.vlgmr.msra.gmra.mxu0 %vm168_vm0, %v163_v10 }
  0x13   : > { %367 = vmatmul.mubr.msk.f32.vlgmr.msra.gmra.mxu1 %vm168_vm0, %v165_v13 }
  0xd2   : > { %v365_v14 = vpop.f32.mrf.mxu0 }
  0xd3   : > { %v368_v15 = vpop.f32.mrf.mxu1  ;;  %v267_v19 = vmul.f32 0.5, %v365_v14 }
  0xd4   : > { %v247_v16 = vpop.f32.mrf.mxu0  ;;  %v269_v21 = vmul.f32 0.5, %v368_v15 }
  0xd5   : > { %v266_v17 = vmul.f32 0.5, %v247_v16  ;;  %v257_v18 = vpop.f32.mrf.mxu1  ;;  %272 = vst.msk [vmem:[%s145_s24 + $0x8] sm:$0xff] %vm270_vm1, %v267_v19 }
  0xd6   : > { %v268_v20 = vmul.f32 0.5, %v257_v18  ;;  %274 = vst.msk [vmem:[%s145_s24 + $0x18] sm:$0xff] %vm270_vm1, %v269_v21 }
  0xd7   : > { %271 = vst.msk [vmem:[%s145_s24] sm:$0xff] %vm270_vm1, %v266_v17 }
  0xd8   : > { %273 = vst.msk [vmem:[%s145_s24 + $0x10] sm:$0xff] %vm270_vm1, %v268_v20 }
  0xd9 PF: > { %s12_s9 = sadd.s32 1, %s387_s9  }
  0xda   : > { %p9_p5 = scmp.ge.s32.totalorder %s12_s9, 4  }
  0xdc   :  { %11 = sbr.rel (!%p9_p5) target bundleno = 1 (0x1), region = 65 }

</bundles_post_ra>
